<compile_context>
chip_gen: v7x
topology: tpu7x:2x2x1
jax: 0.10.0
libtpu: 0.0.40
codegen_flags: <defaults>
</compile_context>

<pallas_src>
import functools

import jax
import jax.numpy as jnp
from jax.experimental import pallas as pl
from jax.experimental.pallas import tpu as pltpu


# ----------------------------- Pallas kernels -------------------------------

def h2_fused_kernel(xcol_ref, strip_ref, wbig_ref, o_ref, *, Cout):
    # xcol_ref : (1, K_pad, T)    bf16  im2col tile (tap-major, channel-minor)
    # strip_ref: (1, Cout,  T)    bf16  x1_expand + x2_expand + bn5 shift
    # wbig_ref : (2*Cout, K_pad)  bf16  [conv3 * bn5_scale ; conv5 on centre tap]
    # o_ref    : (1, Cout,  T)
    acc = jnp.dot(wbig_ref[...], xcol_ref[0],
                  preferred_element_type=jnp.float32)          # (2*Cout, T) f32
    y3 = acc[:Cout, :] + strip_ref[0].astype(jnp.float32)      # conv3+bn5 + strips
    y5 = acc[Cout:, :]                                         # conv5 (1x1)
    o_ref[0] = (y5 * y3).astype(o_ref.dtype)                   # lane-dense store


def h2_split_kernel(xcol_ref, xc_ref, strip_ref, w3_ref, w5_ref, o_ref):
    # Used when 2*Cout exceeds the MXU row block: conv5 gets its own small dot
    # against the original x tile, avoiding zero-column MXU passes and any
    # in-kernel sublane slicing of xcol.
    y3 = jnp.dot(w3_ref[...], xcol_ref[0], preferred_element_type=jnp.float32)
    y3 = y3 + strip_ref[0].astype(jnp.float32)
    y5 = jnp.dot(w5_ref[...], xc_ref[0], preferred_element_type=jnp.float32)
    o_ref[0] = (y5 * y3).astype(o_ref.dtype)


# ------------------------------ JAX glue -------------------------------------

def _bn_fold(bn, eps=1e-5):
    gamma, beta, mean, var = bn
    scale = gamma / jnp.sqrt(var + eps)
    return scale, beta - mean * scale


def _strip_conv(s, w, dilation, bias=None):
    # 1-D "same" conv, kernel size 3, given dilation.  s: (N, L, Cin); w: (3, Cin, Cout)
    L = s.shape[1]
    sp = jnp.pad(s, ((0, 0), (dilation, dilation), (0, 0)))
    out = sum(jnp.einsum('nlc,co->nlo', sp[:, k * dilation:k * dilation + L, :], w[k])
              for k in range(3))
    if bias is not None:
        out = out + bias
    return out


def _round_up(v, m):
    return (v + m - 1) // m * m


def _choose_tile_hw(HW, per_col_bytes, tile_budget_bytes, max_tile=2048):
    # Largest multiple of 128 that divides HW, fits the per-step byte budget,
    # and is <= max_tile.
    cand = max(128, (tile_budget_bytes // max(per_col_bytes, 1)) // 128 * 128)
    tile = max(128, min(HW, max_tile, cand) // 128 * 128)
    while HW % tile:
        tile -= 128
    return tile


def h2_forward_pallas(x_nchw, P, *, matmul_dtype=jnp.bfloat16,
                      out_dtype=jnp.float32, mxu_rows=256,
                      tile_budget_bytes=16 << 20, eps=1e-5):
    """H2_Module forward.  mxu_rows: 256 for v6e/v7x, 128 for v5e.
    out_dtype=jnp.bfloat16 halves output writeback if acceptable downstream."""
    N, Cin, H, W = x_nchw.shape
    Cout = P['w_conv5'].shape[0]
    HW = H * W

    # --- alignment guards (silent relayouts / masked stores otherwise) -----------
    assert HW % 128 == 0, "H*W must be a multiple of 128 (lane-dense tiles/stores)"
    assert Cout % 8 == 0, "Cout must be a multiple of 8 (sublane split of the fused acc)"

    x = x_nchw.astype(jnp.float32)          # strip branches stay f32 for accuracy
    xb = x_nchw.astype(matmul_dtype)        # cast BEFORE im2col (halves blowup bytes)

    # --- folded BN params --------------------------------------------------------
    s1, b1 = _bn_fold(P['bn1'], eps); s2, b2 = _bn_fold(P['bn2'], eps)
    s3, b3 = _bn_fold(P['bn3'], eps); s4, b4 = _bn_fold(P['bn4'], eps)
    s5, b5 = _bn_fold(P['bn5'], eps)

    # --- tiny strip branches (adaptive pools + 1-D convs + BN), plain JAX --------
    w1  = jnp.transpose(P['w_conv1'][:, :, :, 0], (2, 1, 0))       # conv1   (3,1)
    w12 = jnp.transpose(P['w_conv1_2'][:, :, :, 0], (2, 1, 0))     # conv1_2 (3,1), dil 2
    w2  = jnp.transpose(P['w_conv2'][:, :, 0, :], (2, 1, 0))       # conv2   (1,3)
    w21 = jnp.transpose(P['w_conv2_1'][:, :, 0, :], (2, 1, 0))     # conv2_1 (1,3), dil 2

    t1 = jnp.transpose(x.mean(axis=3), (0, 2, 1))                  # pool over W -> (N,H,Cin)
    t1 = _strip_conv(t1, w1, 1) * s1 + b1                          # conv1 + bn1
    t1 = _strip_conv(t1, w12, 2, P['b_conv1_2']) * s3 + b3         # conv1_2 + bn3
    t2 = jnp.transpose(x.mean(axis=2), (0, 2, 1))                  # pool over H -> (N,W,Cin)
    t2 = _strip_conv(t2, w2, 1) * s2 + b2                          # conv2 + bn2
    t2 = _strip_conv(t2, w21, 2, P['b_conv2_1']) * s4 + b4         # conv2_1 + bn4

    # additive field (x1 expand + x2 expand + bn5 shift), stored in matmul dtype
    strip = (jnp.transpose(t1, (0, 2, 1))[:, :, :, None]           # (N, Cout, H, 1)
             + jnp.transpose(t2, (0, 2, 1))[:, :, None, :]         # (N, Cout, 1, W)
             + b5[None, :, None, None])
    strip = strip.reshape(N, Cout, HW).astype(matmul_dtype)

    # --- im2col (tap-major, channel-minor), already in bf16 ----------------------
    K = 9 * Cin
    K_pad = _round_up(K, 16)                 # clean bf16 sublane packing of xcol
    Cin_pad = _round_up(Cin, 16)
    xp = jnp.pad(xb, ((0, 0), (0, 0), (2, 2), (2, 2)))
    taps = [xp[:, :, 2 * kh:2 * kh + H, 2 * kw:2 * kw + W]
            for kh in range(3) for kw in range(3)]
    xcol = jnp.concatenate(taps, axis=1).reshape(N, K, HW)
    if K_pad != K:
        xcol = jnp.pad(xcol, ((0, 0), (0, K_pad - K), (0, 0)))

    # --- weights ------------------------------------------------------------------
    # conv3 (kh,kw,Cin column order) with bn5 scale folded in, K zero-padded
    w3f = jnp.transpose(P['w_conv3'], (0, 2, 3, 1)).reshape(Cout, K) * s5[:, None]
    w3f = jnp.pad(w3f, ((0, 0), (0, K_pad - K)))
    w5f = P['w_conv5'][:, :, 0, 0]                                  # (Cout, Cin)

    use_split = (2 * Cout > mxu_rows)

    # --- tile size / VMEM budget ----------------------------------------------------
    ibytes = jnp.dtype(matmul_dtype).itemsize
    obytes = jnp.dtype(out_dtype).itemsize
    per_col = (2 * ((K_pad + (Cin_pad if use_split else 0)) * ibytes   # dbl-buffered inputs
                    + Cout * ibytes + Cout * obytes)                   # strip + output
               + 2 * Cout * 4)                                         # f32 matmul acc
    tile = _choose_tile_hw(HW, per_col, tile_budget_bytes)
    n_tiles = HW // tile
    w_bytes = (Cout * (K_pad + Cin_pad) if use_split else 2 * Cout * K_pad) * ibytes
    vmem_limit = int(min(max(tile * per_col + 2 * w_bytes + (4 << 20), 32 << 20),
                         48 << 20))          # stays under v7x's 64 MiB physical VMEM

    cparams = pltpu.CompilerParams(
        dimension_semantics=("parallel", "parallel"),
        vmem_limit_bytes=vmem_limit)

    if not use_split:
        # stacked weight matrix (2*Cout, K_pad): conv5 active on the centre tap only
        w5_rows = jnp.zeros((Cout, K_pad), jnp.float32).at[:, 4 * Cin:5 * Cin].set(w5f)
        wbig = jnp.concatenate([w3f, w5_rows], axis=0).astype(matmul_dtype)

        out_flat = pl.pallas_call(
            functools.partial(h2_fused_kernel, Cout=Cout),
            out_shape=jax.ShapeDtypeStruct((N, Cout, HW), out_dtype),
            grid=(N, n_tiles),
            in_specs=[
                pl.BlockSpec((1, K_pad, tile),    lambda b, t: (b, 0, t)),
                pl.BlockSpec((1, Cout, tile),     lambda b, t: (b, 0, t)),
                pl.BlockSpec((2 * Cout, K_pad),   lambda b, t: (0, 0)),
            ],
            out_specs=pl.BlockSpec((1, Cout, tile), lambda b, t: (b, 0, t)),
            compiler_params=cparams,
        )(xcol, strip, wbig)
    else:
        # split path: conv5 dots against the original x tile (centre tap == x)
        xc = xb.reshape(N, Cin, HW)
        if Cin_pad != Cin:
            xc = jnp.pad(xc, ((0, 0), (0, Cin_pad - Cin), (0, 0)))
        w3m = w3f.astype(matmul_dtype)
        w5m = jnp.pad(w5f, ((0, 0), (0, Cin_pad - Cin))).astype(matmul_dtype)

        out_flat = pl.pallas_call(
            h2_split_kernel,
            out_shape=jax.ShapeDtypeStruct((N, Cout, HW), out_dtype),
            grid=(N, n_tiles),
            in_specs=[
                pl.BlockSpec((1, K_pad, tile),    lambda b, t: (b, 0, t)),
                pl.BlockSpec((1, Cin_pad, tile),  lambda b, t: (b, 0, t)),
                pl.BlockSpec((1, Cout, tile),     lambda b, t: (b, 0, t)),
                pl.BlockSpec((Cout, K_pad),       lambda b, t: (0, 0)),
                pl.BlockSpec((Cout, Cin_pad),     lambda b, t: (0, 0)),
            ],
            out_specs=pl.BlockSpec((1, Cout, tile), lambda b, t: (b, 0, t)),
            compiler_params=cparams,
        )(xcol, xc, strip, w3m, w5m)

    return out_flat.reshape(N, Cout, H, W)                          # already NCHW


# -------------------------- pure-JAX reference ------------------------------

def _conv2d_ref(x, w, padding, dilation=(1, 1), bias=None):
    out = jax.lax.conv_general_dilated(
        x, w, window_strides=(1, 1),
        padding=[(padding[0], padding[0]), (padding[1], padding[1])],
        rhs_dilation=dilation,
        dimension_numbers=('NCHW', 'OIHW', 'NCHW'))
    if bias is not None:
        out = out + bias[None, :, None, None]
    return out


def _bn_ref(x, bn, eps=1e-5):
    gamma, beta, mean, var = bn
    return ((x - mean[None, :, None, None]) / jnp.sqrt(var[None, :, None, None] + eps)
            * gamma[None, :, None, None] + beta[None, :, None, None])


def h2_forward_ref(x, P):
    N, _, H, W = x.shape
    x1 = x.mean(axis=3, keepdims=True)
    x1 = _bn_ref(_conv2d_ref(x1, P['w_conv1'], (1, 0)), P['bn1'])
    x1 = _bn_ref(_conv2d_ref(x1, P['w_conv1_2'], (2, 0), (2, 1), P['b_conv1_2']), P['bn3'])
    x1 = jnp.broadcast_to(x1, (N, x1.shape[1], H, W))
    x2 = x.mean(axis=2, keepdims=True)
    x2 = _bn_ref(_conv2d_ref(x2, P['w_conv2'], (0, 1)), P['bn2'])
    x2 = _bn_ref(_conv2d_ref(x2, P['w_conv2_1'], (0, 2), (1, 2), P['b_conv2_1']), P['bn4'])
    x2 = jnp.broadcast_to(x2, (N, x2.shape[1], H, W))
    x3 = _bn_ref(_conv2d_ref(x, P['w_conv3'], (2, 2), (2, 2)), P['bn5'])
    x4 = x1 + x2 + x3
    return _conv2d_ref(x, P['w_conv5'], (0, 0)) * x4


# ------------------------------ parameters ----------------------------------

def make_params(key, Cin, Cout):
    ks = jax.random.split(key, 14)

    def nrm(k, shape, s=0.1):
        return s * jax.random.normal(k, shape, jnp.float32)

    def bn(k):
        k1, k2, k3, k4 = jax.random.split(k, 4)
        return (1.0 + nrm(k1, (Cout,)),                    # gamma
                nrm(k2, (Cout,)),                          # beta
                nrm(k3, (Cout,)),                          # running_mean
                0.5 + 0.2 * jnp.abs(jax.random.normal(k4, (Cout,), jnp.float32)))  # var

    return {
        'w_conv1':   nrm(ks[0], (Cout, Cin, 3, 1)),
        'w_conv2':   nrm(ks[1], (Cout, Cin, 1, 3)),
        'w_conv1_2': nrm(ks[2], (Cout, Cout, 3, 1)),
        'b_conv1_2': nrm(ks[3], (Cout,)),
        'w_conv2_1': nrm(ks[4], (Cout, Cout, 1, 3)),
        'b_conv2_1': nrm(ks[5], (Cout,)),
        'w_conv3':   nrm(ks[6], (Cout, Cin, 3, 3)),
        'w_conv5':   nrm(ks[7], (Cout, Cin, 1, 1)),
        'bn1': bn(ks[8]), 'bn2': bn(ks[9]), 'bn3': bn(ks[10]),
        'bn4': bn(ks[11]), 'bn5': bn(ks[12]),
    }


# --------------------------------- main --------------------------------------

if __name__ == "__main__":
    key = jax.random.PRNGKey(0)
    kp, kx = jax.random.split(key)

    # Cin/Cout multiples of 8 (sublane-aligned), H*W multiple of 128 (lane-dense).
    N, Cin, Cout, H, W = 2, 8, 16, 16, 16
    P = make_params(kp, Cin, Cout)
    x = jax.random.normal(kx, (N, Cin, H, W), jnp.float32)

    ref = h2_forward_ref(x, P)

    # Fused-matmul path (2*Cout <= MXU rows).
    out = jax.block_until_ready(jax.jit(h2_forward_pallas)(x, P))
    assert out.shape == (N, Cout, H, W)
    # bf16 matmul operands + bf16 strip (f32 accumulate/epilogue) -> loosened atol.
    if not bool(jnp.allclose(out, ref, atol=3e-2, rtol=2e-2)):
        err = float(jnp.max(jnp.abs(out - ref)))
        raise SystemExit(f"MISMATCH (fused): max abs err = {err}")

    # Split path, exercised by forcing a tiny MXU-row threshold (as used for
    # Cout > 128 on v6e/v7x or Cout > 64 on v5e).
    out_s = jax.block_until_ready(
        jax.jit(functools.partial(h2_forward_pallas, mxu_rows=16))(x, P))
    if not bool(jnp.allclose(out_s, ref, atol=3e-2, rtol=2e-2)):
        err = float(jnp.max(jnp.abs(out_s - ref)))
        raise SystemExit(f"MISMATCH (split): max abs err = {err}")

    print("KERNEL_OK")
</pallas_src>

<mosaic_0001>
module attributes {stable_mosaic.version = 11 : i64} {
  func.func @h2_fused_kernel(%arg0: i32, %arg1: i32, %arg2: memref<1x80x256xbf16, #tpu.memory_space<vmem>>, %arg3: memref<1x16x256xbf16, #tpu.memory_space<vmem>>, %arg4: memref<32x80xbf16, #tpu.memory_space<vmem>>, %arg5: memref<1x16x256xf32, #tpu.memory_space<vmem>>) attributes {dimension_semantics = [#tpu.dimension_semantics<parallel>, #tpu.dimension_semantics<parallel>], iteration_bounds = array<i64: 2, 1>, scalar_prefetch = 0 : i64, scratch_operands = 0 : i64, tpu.core_type = #tpu.core_type<tc>, window_params = [{transform_indices = @transform_0, window_bounds = array<i64: 1, 80, 256>}, {transform_indices = @transform_1, window_bounds = array<i64: 1, 16, 256>}, {pipeline_mode = #tpu.pipeline_mode<synchronous>, transform_indices = @transform_2, window_bounds = array<i64: 32, 80>}, {transform_indices = @transform_3, window_bounds = array<i64: 1, 16, 256>}]} {
    %c0 = arith.constant 0 : index
    %c0_0 = arith.constant 0 : index
    %0 = vector.load %arg4[%c0, %c0_0] : memref<32x80xbf16, #tpu.memory_space<vmem>>, vector<32x80xbf16>
    %c0_1 = arith.constant 0 : index
    %c0_2 = arith.constant 0 : index
    %c0_3 = arith.constant 0 : index
    %1 = vector.load %arg2[%c0_1, %c0_2, %c0_3] : memref<1x80x256xbf16, #tpu.memory_space<vmem>>, vector<1x80x256xbf16>
    %2 = vector.shape_cast %1 : vector<1x80x256xbf16> to vector<80x256xbf16>
    %cst = arith.constant dense<0.000000e+00> : vector<32x256xf32>
    %3 = tpu.matmul %0, %2, %cst {dimension_numbers = #tpu.dot_dimension_numbers<[1], [0], [0], [1], [0, 0, 1, 1], [], []>} : vector<32x80xbf16>, vector<80x256xbf16>, vector<32x256xf32> -> vector<32x256xf32>
    %4 = vector.extract_strided_slice %3 {offsets = [0, 0], sizes = [16, 256], strides = [1, 1]} : vector<32x256xf32> to vector<16x256xf32>
    %c0_4 = arith.constant 0 : index
    %c0_5 = arith.constant 0 : index
    %c0_6 = arith.constant 0 : index
    %5 = vector.load %arg3[%c0_4, %c0_5, %c0_6] : memref<1x16x256xbf16, #tpu.memory_space<vmem>>, vector<1x16x256xbf16>
    %6 = vector.shape_cast %5 : vector<1x16x256xbf16> to vector<16x256xbf16>
    %7 = arith.extf %6 : vector<16x256xbf16> to vector<16x256xf32>
    %8 = arith.addf %4, %7 : vector<16x256xf32>
    %9 = vector.extract_strided_slice %3 {offsets = [16, 0], sizes = [16, 256], strides = [1, 1]} : vector<32x256xf32> to vector<16x256xf32>
    %10 = arith.mulf %9, %8 : vector<16x256xf32>
    %c0_7 = arith.constant 0 : index
    %c0_8 = arith.constant 0 : index
    %c0_9 = arith.constant 0 : index
    %11 = vector.load %arg5[%c0_7, %c0_8, %c0_9] : memref<1x16x256xf32, #tpu.memory_space<vmem>>, vector<1x16x256xf32>
    %12 = vector.shape_cast %11 : vector<1x16x256xf32> to vector<16x256xf32>
    %13 = vector.shape_cast %10 : vector<16x256xf32> to vector<1x16x256xf32>
    tpu.vector_store %arg5[%c0_7, %c0_8, %c0_9], %13 {strides = array<i32>} : memref<1x16x256xf32, #tpu.memory_space<vmem>>, vector<1x16x256xf32>,
    return
  }
  func.func @transform_0(%arg0: i32, %arg1: i32) -> (i32, i32, i32) {
    %c0_i32 = arith.constant 0 : i32
    %c0_i32_0 = arith.constant 0 : i32
    return %arg0, %c0_i32, %arg1 : i32, i32, i32
  }
  func.func @transform_1(%arg0: i32, %arg1: i32) -> (i32, i32, i32) {
    %c0_i32 = arith.constant 0 : i32
    %c0_i32_0 = arith.constant 0 : i32
    return %arg0, %c0_i32, %arg1 : i32, i32, i32
  }
  func.func @transform_2(%arg0: i32, %arg1: i32) -> (i32, i32) {
    %c0_i32 = arith.constant 0 : i32
    %c0_i32_0 = arith.constant 0 : i32
    %c0_i32_1 = arith.constant 0 : i32
    return %c0_i32, %c0_i32_0 : i32, i32
  }
  func.func @transform_3(%arg0: i32, %arg1: i32) -> (i32, i32, i32) {
    %c0_i32 = arith.constant 0 : i32
    %c0_i32_0 = arith.constant 0 : i32
    return %arg0, %c0_i32, %arg1 : i32, i32, i32
  }
}

</mosaic_0001>

<bundles_post_ra>
// kernel: h2_forward_pallas.1
= control target key start
LH: loop header
LB: loop body
LE: loop exit
PB: predicated region body
PF: predicated region fallthrough
CT: control target
= control target key end

     0   :  { %s630_s12 = smov 0   ;;  %s632_s13 = smov 0   ;;  %s677_s0 = inlined_call_operand.vmem [shape: bf16[2,80,256], index: 0, kind: input, shape index: {}]   ;;  %s678_s1 = inlined_call_operand.vmem [shape: bf16[2,16,256], index: 1, kind: input, shape index: {}]   ;;  %s679_s2 = inlined_call_operand.vmem [shape: bf16[32,80], index: 2, kind: input, shape index: {}]   ;;  %s680_s3 = inlined_call_operand.vmem [shape: f32[2,16,256], index: 3, kind: output, shape index: {}]  }
   0x1   :  { %s634_s14 = smov 0  }
   0x2 LB: > { %s25_s15 = sadd.s32 1, %s603_s13  ;;  %p508_p0 = scmp.ge.s32.totalorder %s607_s14, 1  ;;  %s607_s14 = sphi %s634_s14, %s13_s14   ;;  %s603_s13 = sphi %s632_s13, %s682_s13   ;;  %s599_s12 = sphi %s630_s12, %s681_s12  }
   0x3   : > { %p27_p1 = scmp.ge.s32.totalorder %s25_s15, 2  ;;  %p175_p2 = scmp.lt.s32.totalorder %s607_s14, 3 }
   0x5   : > { %s684_s15 = smov (%p27_p1, %s25_s15), 0  ;;  %p176_p3 = pnand %p508_p0, %p175_p2 }
   0x6   : > { %p217_p4 = scmp.lt.s32.totalorder (!%p176_p3), %s599_s12, 1  ;;  %v609_v0 = vmov (!%p176_p3), 0   ;;  %v583_v11 = vld [vmem:[%s679_s2] sm:$0xff] (!%p176_p3)   ;;  %v584_v12 = vld [vmem:[%s679_s2 + $0x8] sm:$0xff] (!%p176_p3)   ;;  %vm321_vm0 = vcmask (!%p176_p3), 654336  }
   0x7   : > { %179 = sbr.rel (%p176_p3) target bundleno = 259 (0x103), region = 32  ;;  %360 = vmatprep.mubr.bf16.mxu0 (!%p176_p3), %v609_v0  ;;  %370 = vmatprep.mubr.bf16.mxu1 (!%p176_p3), %v609_v0 }
   0xe   : > { %s686_s12 = smov (!%p217_p4, %s599_s12), 1 }
   0xf   : > { %s542_s16 = smul.u32 80, %s686_s12  ;;  %s530_s24 = sshll.u32 %s686_s12, 4 }
  0x10   : > { %s234_s27 = scalar_lea.vmem %s678_s1, %s530_s24  ;;  %s531_s28 = sshll.u32 %s686_s12, 5 }
  0x11   : > { %s224_s19 = scalar_lea.vmem %s677_s0, %s542_s16  ;;  %v381_v13 = vld [vmem:[%s234_s27] sm:$0xff]  ;;  %v382_v14 = vld [vmem:[%s234_s27 + $0x8] sm:$0xff]  ;;  %s244_s4 = scalar_lea.vmem %s680_s3, %s531_s28 }
  0x12   : > { %v568_v1 = vld [vmem:[%s224_s19 + $0x4] ss:$8 sps:$4 sm:$0xff]   ;;  %v570_v2 = vld [vmem:[%s224_s19] ss:$8 sps:$4 sm:$0xff]   ;;  %v571_v3 = vld [vmem:[%s224_s19 + $0x14] ss:$8 sps:$4 sm:$0xff]   ;;  %v383_v15 = vunpack.c.l.bf16 %v381_v13  ;;  %v384_v16 = vunpack.c.h.bf16 %v381_v13  ;;  %v385_v17 = vunpack.c.l.bf16 %v382_v14  ;;  %v386_v20 = vunpack.c.h.bf16 %v382_v14 }
  0x13   : > { %328 = vmatprep.subr.bf16.mxu0 %v568_v1  ;;  %532 = vmatprep.subr.bf16.mxu1 %v568_v1  ;;  %v573_v4 = vld [vmem:[%s224_s19 + $0x10] ss:$8 sps:$4 sm:$0xff]   ;;  %v574_v5 = vld [vmem:[%s224_s19 + $0x24] ss:$8 sps:$4 sm:$0xff]   ;;  %v576_v6 = vld [vmem:[%s224_s19 + $0x20] ss:$8 sps:$4 sm:$0xff]  }
  0x14   : > { %329 = vmatpush1.bf16.msra.mxu0 %v570_v2  ;;  %537 = vmatpush1.bf16.msra.mxu1 %v570_v2  ;;  %v577_v7 = vld [vmem:[%s224_s19 + $0x34] ss:$8 sps:$4 sm:$0xff]   ;;  %v579_v8 = vld [vmem:[%s224_s19 + $0x30] ss:$8 sps:$4 sm:$0xff]   ;;  %v580_v9 = vld [vmem:[%s224_s19 + $0x44] ss:$8 sps:$4 sm:$0xff]  }
  0x15   : > { %330 = vmatprep.subr.bf16.mxu0 %v571_v3  ;;  %533 = vmatprep.subr.bf16.mxu1 %v571_v3  ;;  %v582_v10 = vld [vmem:[%s224_s19 + $0x40] ss:$8 sps:$4 sm:$0xff]  }
  0x18   : > { %331 = vmatpush1.bf16.msra.mxu0 %v573_v4  ;;  %538 = vmatpush1.bf16.msra.mxu1 %v573_v4 }
  0x19   : > { %332 = vmatprep.subr.bf16.mxu0 %v574_v5  ;;  %534 = vmatprep.subr.bf16.mxu1 %v574_v5 }
  0x1c   : > { %333 = vmatpush1.bf16.msra.mxu0 %v576_v6  ;;  %539 = vmatpush1.bf16.msra.mxu1 %v576_v6 }
  0x1d   : > { %334 = vmatprep.subr.bf16.mxu0 %v577_v7  ;;  %535 = vmatprep.subr.bf16.mxu1 %v577_v7 }
  0x20   : > { %335 = vmatpush1.bf16.msra.mxu0 %v579_v8  ;;  %540 = vmatpush1.bf16.msra.mxu1 %v579_v8 }
  0x21   : > { %336 = vmatprep.subr.bf16.mxu0 %v580_v9  ;;  %536 = vmatprep.subr.bf16.mxu1 %v580_v9 }
  0x24   : > { %337 = vmatpush1.bf16.msra.mxu0 %v582_v10  ;;  %541 = vmatpush1.bf16.msra.mxu1 %v582_v10 }
  0x27   : > { %526 = vmatmul.mubr.msk.bf16.vlgmr.msra.gmra.mrb[0].mxu0 %vm321_vm0, %v583_v11  ;;  %527 = vmatmul.mubr.msk.bf16.vlgmr.msra.gmra.mrb[0].mxu1 %vm321_vm0, %v584_v12 }
  0xfa   : > { %v362_v18 = vpop.f32.mrb[0].mxu0  ;;  %v372_v19 = vpop.f32.mrb[0].mxu1 }
  0xfb   : > { %v387_v21 = vadd.f32 %v383_v15, %v362_v18  ;;  %v364_v22 = vpop.f32.mrb[1].mxu0  ;;  %v374_v23 = vpop.f32.mrb[1].mxu1 }
  0xfc   : > { %v388_v24 = vadd.f32 %v384_v16, %v364_v22  ;;  %v366_v25 = vpop.f32.mrb[2].mxu0  ;;  %v376_v26 = vpop.f32.mrb[2].mxu1 }
  0xfd   : > { %v391_v27 = vmul.f32 %v387_v21, %v372_v19  ;;  %v389_v28 = vadd.f32 %v385_v17, %v366_v25  ;;  %v368_v29 = vpop.f32.mrb[3].mxu0  ;;  %v378_v30 = vpop.f32.mrb[3].mxu1 }
  0xfe   : > { %v392_v31 = vmul.f32 %v388_v24, %v374_v23  ;;  %v390_v32 = vadd.f32 %v386_v20, %v368_v29 }
  0xff   : > { %395 = vst [vmem:[%s244_s4] sm:$0xff] %v391_v27  ;;  %v393_v33 = vmul.f32 %v389_v28, %v376_v26 }
 0x100   : > { %396 = vst [vmem:[%s244_s4 + $0x8] sm:$0xff] %v392_v31  ;;  %v394_v34 = vmul.f32 %v390_v32, %v378_v30 }
 0x101   : > { %397 = vst [vmem:[%s244_s4 + $0x10] sm:$0xff] %v393_v33 }
 0x102   : > { %398 = vst [vmem:[%s244_s4 + $0x18] sm:$0xff] %v394_v34 }
 0x103 PF: > { %s13_s14 = sadd.s32 1, %s607_s14   ;;  %s681_s12 = smov %s603_s13 }
 0x104   : > { %p10_p5 = scmp.ge.s32.totalorder %s13_s14, 4   ;;  %s682_s13 = smov %s684_s15 }
 0x106   :  { %12 = sbr.rel (!%p10_p5) target bundleno = 2 (0x2), region = 65 }

</bundles_post_ra>
